<compile_context>
chip_gen: v7x
topology: tpu7x:2x2x1
jax: 0.10.0
libtpu: 0.0.40
codegen_flags: <defaults>
</compile_context>

<pallas_src>
import functools

import jax
import jax.numpy as jnp
from jax.experimental import pallas as pl
from jax.experimental.pallas import tpu as pltpu


def _round_up(x, m):
    return ((x + m - 1) // m) * m


def _chip_vmem_bytes():
    """Physical per-core VMEM; conservative (v7x-sized) fallback if query fails."""
    try:
        info = pltpu.get_tpu_info()
        cap = int(getattr(info, "vmem_capacity_bytes", 0))
        if cap > 0:
            return cap
    except Exception:
        pass
    return 64 << 20


def _patch_embed_kernel(x_ref, w_ref, b_ref, o_ref):
    # x_ref: (tm, Kp)  w_ref: (Kp, E)  b_ref: (1, E) f32  o_ref: (tm, E)
    acc = jnp.dot(x_ref[...], w_ref[...], preferred_element_type=jnp.float32)
    o_ref[...] = (acc + b_ref[...]).astype(o_ref.dtype)


def make_patch_embed_params(weight, bias, *, compute_dtype=jnp.bfloat16):
    """One-time setup (hoisted per review): Conv2d OIHW weight -> (Kp, E) matmul weight.

    weight: (E, C, ph, pw), bias: (E,).  Returns (w_mat (Kp, E), b_mat (1, E) f32).
    """
    E, C, ph, pw = weight.shape
    K = C * ph * pw
    Kp = _round_up(K, 128)                      # lane-dense contraction dim
    w_mat = jnp.transpose(weight.reshape(E, K)).astype(compute_dtype)   # (K, E)
    if Kp != K:
        w_mat = jnp.pad(w_mat, ((0, Kp - K), (0, 0)))
    b_mat = bias.reshape(1, E).astype(jnp.float32)
    return w_mat, b_mat


@functools.partial(jax.jit,
                   static_argnames=("patch_size", "compute_dtype", "out_dtype"))
def patch_embed(x, w_mat, b_mat, *, patch_size, compute_dtype=jnp.bfloat16,
                out_dtype=None):
    """Forward pass of PatchEmbed.

    Args:
      x:      (B, C, H, W)  input image, NCHW (PyTorch convention)
      w_mat:  (Kp, E)       prepared weight from make_patch_embed_params
      b_mat:  (1, E) f32    prepared bias   from make_patch_embed_params
      out_dtype: output dtype (default x.dtype; pass bf16 to halve output HBM
                 traffic if downstream accepts it)
    Returns:
      (B, num_patches, E)
    """
    B, C, H, W = x.shape
    ph = pw = patch_size
    assert H % ph == 0 and W % pw == 0, (
        f"Input image size ({H}x{W}) must be divisible by patch size {patch_size}.")
    gh, gw = H // ph, W // pw
    num_patches = gh * gw
    K = C * ph * pw
    Kp, E = w_mat.shape
    assert Kp == _round_up(K, 128), "w_mat geometry does not match (C, patch_size)"
    M = B * num_patches
    out_dtype = x.dtype if out_dtype is None else out_dtype

    # --- patch extraction: (B,C,H,W) -> (M, K), flatten order (C, ph, pw) ---
    # Single XLA transpose; the bf16 cast fuses into it so the written side is
    # half-sized.  (On-chip variant deferred — see module-level TODO(synk).)
    patches = x.reshape(B, C, gh, ph, gw, pw)
    patches = jnp.transpose(patches, (0, 2, 4, 1, 3, 5)).reshape(M, K)
    patches = patches.astype(compute_dtype)
    if Kp != K:
        patches = jnp.pad(patches, ((0, 0), (0, Kp - K)))

    # --- chip-aware M tiling: big tiles, masked tail, >= 2 blocks when possible ---
    vmem_cap = _chip_vmem_bytes()
    tm_max = 4096 if vmem_cap >= (128 << 20) else 2048
    half = -(-M // 2)                       # ceil(M/2): >=2 blocks -> both v7x TCs
    tm = _round_up(half, 256) if half >= 256 else _round_up(half, 8)
    tm = min(tm, tm_max)
    if tm >= M:
        tm = M                              # tiny M: single full-extent block
    grid_m = pl.cdiv(M, tm)                 # partial tail block is masked; garbage
                                            # rows in it are never written out.

    # --- VMEM budget (weight resident w/ constant index_map; budget 2x anyway) ---
    in_b = jnp.dtype(compute_dtype).itemsize
    out_b = jnp.dtype(out_dtype).itemsize
    needed = (2 * Kp * E * in_b             # resident weight (conservatively x2)
              + 2 * tm * Kp * in_b          # patches double buffer
              + 2 * tm * E * out_b          # output double buffer
              + 2 * 8 * E * 4)              # bias
    cap_limit = (48 << 20) if vmem_cap <= (64 << 20) else (96 << 20)
    vmem_limit = int(min(max(needed + (8 << 20), 32 << 20), cap_limit))

    cost = pl.CostEstimate(
        flops=2 * M * Kp * E,
        transcendentals=0,
        bytes_accessed=M * Kp * in_b + Kp * E * in_b + M * E * out_b + E * 4,
    )

    out = pl.pallas_call(
        _patch_embed_kernel,
        out_shape=jax.ShapeDtypeStruct((M, E), out_dtype),
        grid_spec=pltpu.PrefetchScalarGridSpec(
            num_scalar_prefetch=0,
            grid=(grid_m,),
            in_specs=[
                pl.BlockSpec((tm, Kp), lambda i: (i, 0)),
                # Constant index_map -> fetched once, kept resident across steps.
                pl.BlockSpec((Kp, E), lambda i: (0, 0)),
                pl.BlockSpec((1, E), lambda i: (0, 0)),
            ],
            out_specs=pl.BlockSpec((tm, E), lambda i: (i, 0)),
        ),
        compiler_params=pltpu.CompilerParams(
            dimension_semantics=("parallel",),
            vmem_limit_bytes=vmem_limit,
        ),
        cost_estimate=cost,
    )(patches, w_mat, b_mat)

    return out.reshape(B, num_patches, E)


if __name__ == "__main__":
    # Small shapes consistent with PatchEmbed: img 16x16, patch 4, C=4, E=32.
    B, C, H, W = 2, 4, 16, 16
    patch_size = 4
    embed_dim = 32

    key = jax.random.PRNGKey(0)
    kx, kw, kb = jax.random.split(key, 3)
    x = jax.random.normal(kx, (B, C, H, W), dtype=jnp.float32)
    weight = jax.random.normal(kw, (embed_dim, C, patch_size, patch_size),
                               dtype=jnp.float32) * 0.02
    bias = jax.random.normal(kb, (embed_dim,), dtype=jnp.float32) * 0.02

    # Reference: XLA conv + flatten(2).transpose(1, 2)
    ref = jax.lax.conv_general_dilated(
        x, weight,
        window_strides=(patch_size, patch_size),
        padding="VALID",
        dimension_numbers=("NCHW", "OIHW", "NCHW"),
    ) + bias[None, :, None, None]
    ref = ref.reshape(B, embed_dim, -1).transpose(0, 2, 1)

    num_patches = (H // patch_size) * (W // patch_size)

    # f32 compute path: near-exact vs reference.
    w32, b32 = make_patch_embed_params(weight, bias, compute_dtype=jnp.float32)
    out_f32 = patch_embed(x, w32, b32, patch_size=patch_size,
                          compute_dtype=jnp.float32)
    out_f32 = jax.block_until_ready(out_f32)
    assert out_f32.shape == (B, num_patches, embed_dim)
    assert jnp.allclose(out_f32, ref, atol=1e-4, rtol=1e-4)

    # bf16 MXU path (default): f32 accumulation covers the MXU only; operands
    # are rounded to bf16, hence the loose tolerance.
    wbf, bbf = make_patch_embed_params(weight, bias, compute_dtype=jnp.bfloat16)
    out_bf16 = patch_embed(x, wbf, bbf, patch_size=patch_size)
    out_bf16 = jax.block_until_ready(out_bf16)
    assert out_bf16.shape == (B, num_patches, embed_dim)
    assert jnp.allclose(out_bf16, ref, atol=2e-2, rtol=2e-2)

    print("KERNEL_OK")
</pallas_src>

<mosaic_0001>
module attributes {stable_mosaic.version = 11 : i64} {
  func.func @_patch_embed_kernel(%arg0: i32, %arg1: memref<16x128xf32, #tpu.memory_space<vmem>>, %arg2: memref<128x32xf32, #tpu.memory_space<vmem>>, %arg3: memref<1x32xf32, #tpu.memory_space<vmem>>, %arg4: memref<16x32xf32, #tpu.memory_space<vmem>>) attributes {dimension_semantics = [#tpu.dimension_semantics<parallel>], iteration_bounds = array<i64: 2>, scalar_prefetch = 0 : i64, scratch_operands = 0 : i64, tpu.core_type = #tpu.core_type<tc>, window_params = [{transform_indices = @transform_0, window_bounds = array<i64: 16, 128>}, {pipeline_mode = #tpu.pipeline_mode<synchronous>, transform_indices = @transform_1, window_bounds = array<i64: 128, 32>}, {pipeline_mode = #tpu.pipeline_mode<synchronous>, transform_indices = @transform_2, window_bounds = array<i64: 1, 32>}, {transform_indices = @transform_3, window_bounds = array<i64: 16, 32>}]} {
    %c0 = arith.constant 0 : index
    %c0_0 = arith.constant 0 : index
    %0 = vector.load %arg1[%c0, %c0_0] : memref<16x128xf32, #tpu.memory_space<vmem>>, vector<16x128xf32>
    %c0_1 = arith.constant 0 : index
    %c0_2 = arith.constant 0 : index
    %1 = vector.load %arg2[%c0_1, %c0_2] : memref<128x32xf32, #tpu.memory_space<vmem>>, vector<128x32xf32>
    %cst = arith.constant dense<0.000000e+00> : vector<16x32xf32>
    %2 = tpu.matmul %0, %1, %cst {dimension_numbers = #tpu.dot_dimension_numbers<[1], [0], [0], [1], [0, 0, 1, 1], [], []>} : vector<16x128xf32>, vector<128x32xf32>, vector<16x32xf32> -> vector<16x32xf32>
    %c0_3 = arith.constant 0 : index
    %c0_4 = arith.constant 0 : index
    %3 = vector.load %arg3[%c0_3, %c0_4] : memref<1x32xf32, #tpu.memory_space<vmem>>, vector<1x32xf32>
    %4 = vector.broadcast %3 : vector<1x32xf32> to vector<16x32xf32>
    %5 = arith.addf %2, %4 : vector<16x32xf32>
    %c0_5 = arith.constant 0 : index
    %c0_6 = arith.constant 0 : index
    %6 = vector.load %arg4[%c0_5, %c0_6] : memref<16x32xf32, #tpu.memory_space<vmem>>, vector<16x32xf32>
    tpu.vector_store %arg4[%c0_5, %c0_6], %5 {strides = array<i32>} : memref<16x32xf32, #tpu.memory_space<vmem>>, vector<16x32xf32>,
    return
  }
  func.func @transform_0(%arg0: i32) -> (i32, i32) {
    %c0_i32 = arith.constant 0 : i32
    %c0_i32_0 = arith.constant 0 : i32
    return %arg0, %c0_i32 : i32, i32
  }
  func.func @transform_1(%arg0: i32) -> (i32, i32) {
    %c0_i32 = arith.constant 0 : i32
    %c0_i32_0 = arith.constant 0 : i32
    %c0_i32_1 = arith.constant 0 : i32
    return %c0_i32, %c0_i32_0 : i32, i32
  }
  func.func @transform_2(%arg0: i32) -> (i32, i32) {
    %c0_i32 = arith.constant 0 : i32
    %c0_i32_0 = arith.constant 0 : i32
    %c0_i32_1 = arith.constant 0 : i32
    return %c0_i32, %c0_i32_0 : i32, i32
  }
  func.func @transform_3(%arg0: i32) -> (i32, i32) {
    %c0_i32 = arith.constant 0 : i32
    %c0_i32_0 = arith.constant 0 : i32
    return %arg0, %c0_i32 : i32, i32
  }
}

</mosaic_0001>

<bundles_post_ra>
// kernel: patch_embed.1
= control target key start
LH: loop header
LB: loop body
LE: loop exit
PB: predicated region body
PF: predicated region fallthrough
CT: control target
= control target key end

     0   :  { %8 = vsyncpa [#allocation3], 0  ;;  %s731_s0 = inlined_call_operand.vmem [shape: f32[32,128], index: 0, kind: input, shape index: {}]   ;;  %s732_s1 = inlined_call_operand.vmem [shape: f32[128,32], index: 1, kind: input, shape index: {}]   ;;  %s733_s2 = inlined_call_operand.vmem [shape: f32[1,32], index: 2, kind: input, shape index: {}]   ;;  %s734_s3 = inlined_call_operand.hbm [shape: f32[32,32], index: 3, kind: output, shape index: {}]  }
   0x1   :  { %10 = vsyncpa [#allocation3 + $0x1], 0  ;;  %s578_s12 = smov 0   ;;  %s580_s13 = smov 0  }
   0x2   :  { %s582_s14 = smov 0   ;;  %s584_s15 = smov 0  }
   0x3 LB: > { %s599_s16 = sadd.s32 4294967295, %s553_s15   ;;  %s351_s17 = sadd.s32 4294967294, %s553_s15   ;;  %s553_s15 = sphi %s584_s15, %s740_s15   ;;  %s549_s14 = sphi %s582_s14, %s739_s14   ;;  %s545_s13 = sphi %s580_s13, %s738_s13   ;;  %s541_s12 = sphi %s578_s12, %s737_s12  }
   0x4   : > { %s603_s18 = sadd.s32 1, %s553_s15   ;;  %s91_s19 = sadd.s32 1, %s549_s14 }
   0x5   : > { %s88_s20 = ssub.s32 %s553_s15, %s603_s18  ;;  %p101_p0 = scmp.ne.s32.totalorder %s549_s14, %s545_s13 }
   0x6   : > { %p89_p1 = scmp.eq.s32.totalorder %s88_s20, 0  ;;  %p102_p2 = scmp.eq.s32.totalorder %s599_s16, 1 }
   0x7   : > { %p107_p3 = scmp.ne.s32.totalorder %s545_s13, %s541_s12  ;;  %p108_p4 = scmp.eq.s32.totalorder %s351_s17, 1 }
   0x8   : > { %s614_s21 = scalar_select %p89_p1, %s549_s14, %s91_s19  }
   0x9   : > { %p616_p5 = por %p102_p2, %p101_p0  ;;  %p620_p6 = por %p108_p4, %p107_p3 }
   0xa   : > { %p354_p7 = scmp.ge.s32.totalorder %s553_s15, 1  ;;  %p141_p8 = scmp.lt.s32.totalorder %s553_s15, 3 }
   0xc   : > { %p142_p9 = pnand %p354_p7, %p141_p8 }
   0xd   : > { %v174_v0 = vld [vmem:[%s732_s1] sm:$0xff] (!%p142_p9)  ;;  %v175_v1 = vld [vmem:[%s732_s1 + $0x8] sm:$0xff] (!%p142_p9)  ;;  %v176_v2 = vld [vmem:[%s732_s1 + $0x10] sm:$0xff] (!%p142_p9)  ;;  %s356_s30 = sshll.u32 (!%p142_p9), %s599_s16, 1  ;;  %s162_s25 = sand.u32 (!%p142_p9), 1, %s545_s13   ;;  %vm272_vm0 = vcmask (!%p142_p9), 261120  }
   0xe   : > { %145 = sbr.rel (%p142_p9) target bundleno = 278 (0x116), region = 32  ;;  %v418_v3 = vpack.c.bf16 (!%p142_p9), %v175_v1, %v174_v0  ;;  %v177_v4 = vld [vmem:[%s732_s1 + $0x18] sm:$0xff] (!%p142_p9)  ;;  %p166_p10 = scmp.lt.s32.totalorder (!%p142_p9), %s356_s30, 3  ;;  %v178_v6 = vld [vmem:[%s732_s1 + $0x20] sm:$0xff] (!%p142_p9)  ;;  %v179_v7 = vld [vmem:[%s732_s1 + $0x28] sm:$0xff] (!%p142_p9) }
   0xf   : > { %v422_v5 = vpack.c.bf16 (!%p142_p9), %v177_v4, %v176_v2  ;;  %v426_v8 = vpack.c.bf16 (!%p142_p9), %v179_v7, %v178_v6  ;;  %v180_v9 = vld [vmem:[%s732_s1 + $0x30] sm:$0xff] (!%p142_p9)  ;;  %v181_v10 = vld [vmem:[%s732_s1 + $0x38] sm:$0xff] (!%p142_p9)  ;;  %v182_v13 = vld [vmem:[%s732_s1 + $0x40] sm:$0xff] (!%p142_p9)  ;;  %s355_s27 = sshll.u32 (!%p142_p9), %s162_s25, 4  ;;  %s364_s5 = sshll.u32 (!%p142_p9), %s599_s16, 8 }
  0x10   : > { %419 = vmatprep.subr.bf16.mxu0 (!%p142_p9), %v418_v3  ;;  %v430_v12 = vpack.c.bf16 (!%p142_p9), %v181_v10, %v180_v9  ;;  %v183_v14 = vld [vmem:[%s732_s1 + $0x48] sm:$0xff] (!%p142_p9)  ;;  %v184_v16 = vld [vmem:[%s732_s1 + $0x50] sm:$0xff] (!%p142_p9)  ;;  %v185_v17 = vld [vmem:[%s732_s1 + $0x58] sm:$0xff] (!%p142_p9)  ;;  %s688_s7 = scalar_lea.hbm (!%p142_p9), %s734_s3, %s364_s5  ;;  %s690_s8 = scalar_lea.sflag (!%p142_p9), [#allocation3], %s162_s25 }
  0x11   : > { %421 = vmatpush3.bf16.msra.mxu0 (!%p142_p9), %v418_v3  ;;  %v434_v15 = vpack.c.bf16 (!%p142_p9), %v183_v14, %v182_v13  ;;  %v438_v18 = vpack.c.bf16 (!%p142_p9), %v185_v17, %v184_v16  ;;  %v186_v19 = vld [vmem:[%s732_s1 + $0x60] sm:$0xff] (!%p142_p9)  ;;  %v187_v20 = vld [vmem:[%s732_s1 + $0x68] sm:$0xff] (!%p142_p9)  ;;  %v188_v22 = vld [vmem:[%s732_s1 + $0x70] sm:$0xff] (!%p142_p9)  ;;  %s555_s9 = smov (!%p142_p9), [#allocation2]  }
  0x12   : > { %423 = vmatprep.subr.bf16.mxu0 (!%p142_p9), %v422_v5  ;;  %v442_v21 = vpack.c.bf16 (!%p142_p9), %v187_v20, %v186_v19  ;;  %v189_v23 = vld [vmem:[%s732_s1 + $0x78] sm:$0xff] (!%p142_p9)  ;;  %v358_v26 = vld [vmem:[%s733_s2] ss:$0 sm:$0xff] (!%p142_p9) }
  0x13   : > { %v446_v24 = vpack.c.bf16 (!%p142_p9), %v189_v23, %v188_v22 }
  0x15   : > { %s742_s30 = smov (!%p166_p10, %s356_s30), 3  ;;  %425 = vmatpush3.bf16.msra.mxu0 %v422_v5 }
  0x16   : > { %s357_s10 = sshll.u32 %s742_s30, 3  ;;  %427 = vmatprep.subr.bf16.mxu0 %v426_v8  ;;  %s164_s30 = scalar_lea.vmem [#allocation2], %s355_s27 }
  0x17   : > { %s169_s26 = scalar_lea.vmem %s731_s0, %s357_s10  ;;  %s289_s4 = sshll.u32 %s164_s30, 4  ;;  %s683_s4 = int_to_ptr.vmem [resolvable:$true] %s289_s4 }
  0x18   : > { %v172_v11 = vld [vmem:[%s169_s26] sm:$0xff]  ;;  %v173_v25 = vld [vmem:[%s169_s26 + $0x8] sm:$0xff]  ;;  %s491_s16 = scalar_lea.vmem %s683_s4, 256  ;;  %s495_s10 = sshll.u32 %s555_s9, 4  ;;  %s496_s10 = int_to_ptr.vmem [resolvable:$false] %s495_s10 }
  0x19   : > { %415 = vmatprep.mubr.f32.mxu0 %v172_v11  ;;  %429 = vmatpush3.bf16.msra.mxu0 %v426_v8  ;;  %p492_p11 = scmp.ne.s32.totalorder %s683_s4, %s491_s16  ;;  %s497_s11 = scalar_lea.vmem %s496_s10, 512 }
  0x1a   : > { %431 = vmatprep.subr.bf16.mxu0 %v430_v12  ;;  %p498_p0 = scmp.lt.s32.totalorder %s683_s4, %s496_s10  ;;  %p499_p1 = scmp.lt.s32.totalorder %s497_s11, %s491_s16 }
  0x1b   : > { %p493_p12 = pnand %p492_p11, %p616_p5 }
  0x1c   : > { %p500_p2 = por %p499_p1, %p498_p0 }
  0x1d   : > { %433 = vmatpush3.bf16.msra.mxu0 %v430_v12  ;;  %p494_p13 = pneg %p493_p12 }
  0x1e   : > { %435 = vmatprep.subr.bf16.mxu0 %v434_v15 }
  0x1f   : > { %p501_p3 = pnand %p500_p2, %p494_p13 }
  0x21   : > { %437 = vmatpush3.bf16.msra.mxu0 %v434_v15 }
  0x22   : > { %439 = vmatprep.subr.bf16.mxu0 %v438_v18 }
  0x25   : > { %441 = vmatpush3.bf16.msra.mxu0 %v438_v18 }
  0x26   : > { %443 = vmatprep.subr.bf16.mxu0 %v442_v21 }
  0x29   : > { %445 = vmatpush3.bf16.msra.mxu0 %v442_v21 }
  0x2a   : > { %447 = vmatprep.subr.bf16.mxu0 %v446_v24 }
  0x2d   : > { %449 = vmatpush3.bf16.msra.mxu0 %v446_v24 }
  0x30   : > { %416 = vmatmul.mubr.f32.vlgmr.msra.gmra.mrb[0].mxu0 %v173_v25 }
 0x103   : > { %v417_v27 = vpop.f32.mrb[0].mxu0 }
 0x104   : > { %v269_v28 = vadd.f32 %v417_v27, %v358_v26  ;;  %v263_v29 = vpop.f32.mrb[1].mxu0 }
 0x105   : > { %v264_v30 = vadd.f32 %v358_v26, %v263_v29 }
 0x106   : > { %274 = vst.msk [vmem:[%s164_s30 + $0x8] sm:$0xff] %vm272_vm0, %v269_v28 }
 0x107   : > { %273 = vst.msk [vmem:[%s164_s30] sm:$0xff] %vm272_vm0, %v264_v30 }
 0x108   : > { %504 = shalt.err (!%p501_p3)
}
 0x109   : > { %s505_s17 = scalar_lea.hbm %s688_s7, 256  ;;  %s509_s24 = scalar_lea.hbm %s734_s3, 512 }
 0x10a   : > { %p506_p4 = scmp.ne.s32.totalorder %s688_s7, %s505_s17  ;;  %p510_p9 = scmp.lt.u32.totalorder %s688_s7, %s734_s3 }
 0x10b   : > { %p511_p10 = scmp.lt.u32.totalorder %s509_s24, %s505_s17  ;;  %p513_p12 = scmp.lt.u32.totalorder %s505_s17, %s688_s7 }
 0x10c   : > { %p507_p7 = pnand %p506_p4, %p616_p5 }
 0x10d   : > { %p512_p11 = por %p511_p10, %p510_p9 }
 0x10e   : > { %p508_p8 = pneg %p507_p7 }
 0x10f   : > { %p514_p13 = por %p513_p12, %p512_p11 }
 0x111   : > { %p515_p0 = pnand %p514_p13, %p508_p8 }
 0x113   : > { %518 = shalt.err (!%p515_p0)
}
 0x114   : > { %s556_s28 = smov 128   ;;  %s557_s29 = smov 8  }
 0x115   : > { %450 = dma.vmem_to_hbm [thread:$0]  (%p616_p5), %s683_s4, 256, %s688_s7, %s690_s8, %s556_s28, %s556_s28, %s557_s29  }
 0x116 PF: > { %p456_p1 = scmp.ge.s32.totalorder %s553_s15, 2  ;;  %s304_s30 = sand.u32 1, %s541_s12  }
 0x117   : > { %s305_s5 = scalar_lea.sflag [#allocation3], %s304_s30 }
 0x118   : > { %p453_p2 = pnand %p456_p1, %p620_p6 }
 0x11a   : > { %536 = dma.done.wait (!%p453_p2), %s305_s5, 256  }
 0x11b   : > { %538 = vsyncadd (!%p453_p2), %s305_s5, 4294967040  ;;  %p13_p3 = scmp.ge.s32.totalorder %s603_s18, 4   ;;  %s737_s12 = smov %s545_s13 }
 0x11c   : > { %s738_s13 = smov %s549_s14  ;;  %s739_s14 = smov %s614_s21 }
 0x11d   : > { %s740_s15 = smov %s603_s18  ;;  %15 = sbr.rel (!%p13_p3) target bundleno = 3 (0x3), region = 67 }
 0x124   :  { %310 = vsyncpa [#allocation3], 1 }
 0x125   :  { %312 = vsyncpa [#allocation3 + $0x1], 1 }

</bundles_post_ra>
